<compile_context>
chip_gen: v7x
topology: tpu7x:2x2x1
jax: 0.10.0
libtpu: 0.0.40
codegen_flags: <defaults>
</compile_context>

<pallas_src>
import functools

import jax
import jax.numpy as jnp
from jax.experimental import pallas as pl
from jax.experimental.pallas import tpu as pltpu


def topic_embedding_kernel(w_ref, tv_ref, o_ref, *, approx_reciprocal):
    # w_ref : [TB, T]  doc_weights tile (logits)
    # tv_ref: [T,  D]  topic vectors (VMEM-resident across all batch tiles)
    # o_ref : [TB, D]  doc vectors tile
    w = w_ref[...].astype(jnp.float32)

    # Numerically-stable softmax along the topic axis (PyTorch dim=1 for 2-D).
    m = jnp.max(w, axis=-1, keepdims=True)
    e = jnp.exp(w - m)
    denom = jnp.sum(e, axis=-1, keepdims=True)
    if approx_reciprocal:
        probs = e * pl.reciprocal(denom, approx=True)   # EUP vrcp: free VLIW slot
    else:
        probs = e / denom                               # exact, for PyTorch parity

    # Weighted sum over topics == matmul on the MXU, f32 accumulation.
    doc_vecs = jnp.dot(probs, tv_ref[...].astype(jnp.float32),
                       preferred_element_type=jnp.float32)
    o_ref[...] = doc_vecs.astype(o_ref.dtype)


def topic_embedding_forward(doc_weights, topic_vectors, *,
                            block_batch=16384,
                            out_dtype=None,
                            min_grid_steps=2,
                            vmem_budget_bytes=40 * 1024 * 1024,
                            approx_reciprocal=False):
    """Forward pass of lda2vec topic_embedding.

    doc_weights:   [B, n_topics] logits (f32 or bf16).
    topic_vectors: [n_topics, D] topic embedding matrix.

    block_batch:       batch rows per grid step (auto-clamped to VMEM budget
                       and to keep >= min_grid_steps grid steps).
    out_dtype:         output dtype; defaults to doc_weights.dtype (PyTorch
                       parity).  Pass jnp.bfloat16 to halve the dominant HBM
                       writeback (~1.8x win, mem-bound kernel).
    min_grid_steps:    keep at least this many grid steps when B allows, so
                       the "parallel" batch axis feeds both TCs on v7x.
    vmem_budget_bytes: cap on double-buffered tile VMEM (safe across gens).
    approx_reciprocal: use EUP approximate reciprocal in the softmax.
    """
    B, T = doc_weights.shape
    T2, D = topic_vectors.shape
    assert T == T2, "topic axis mismatch"

    out_dtype = jnp.dtype(out_dtype if out_dtype is not None
                          else doc_weights.dtype)
    in_itemsize = jnp.dtype(doc_weights.dtype).itemsize
    tv_itemsize = jnp.dtype(topic_vectors.dtype).itemsize
    out_itemsize = out_dtype.itemsize

    # --- Batch tile sizing ------------------------------------------------
    # Double-buffered VMEM cost per batch row (logits in + doc-vectors out).
    bytes_per_row = 2 * (T * in_itemsize + D * out_itemsize)
    resident_bytes = 2 * T * D * tv_itemsize        # topic_vectors buffers
    headroom = 2 * 1024 * 1024                      # Mosaic internal scratch
    max_rows_vmem = max(8, (vmem_budget_bytes - resident_bytes - headroom)
                        // bytes_per_row)

    TB = min(block_batch, B, int(max_rows_vmem))
    # Keep the grid populated so both v7x TensorCores get work.
    if min_grid_steps > 1 and B >= min_grid_steps * 8:
        TB = min(TB, pl.cdiv(B, min_grid_steps))
    # Second-to-last block dim must be a multiple of 8 or the full extent.
    if TB != B and TB % 8 != 0:
        TB = max(8, (TB // 8) * 8)
    grid = (pl.cdiv(B, TB),)

    vmem_needed = TB * bytes_per_row + resident_bytes + headroom
    vmem_limit = int(min(max(vmem_needed, 8 * 1024 * 1024),
                         vmem_budget_bytes + headroom))

    cost = pl.CostEstimate(
        flops=2 * B * T * D,
        transcendentals=B * T,
        bytes_accessed=(B * T * in_itemsize
                        + T * D * tv_itemsize
                        + B * D * out_itemsize),
    )

    kernel = functools.partial(topic_embedding_kernel,
                               approx_reciprocal=approx_reciprocal)

    return pl.pallas_call(
        kernel,
        out_shape=jax.ShapeDtypeStruct((B, D), out_dtype),
        grid_spec=pl.GridSpec(
            grid=grid,
            in_specs=[
                pl.BlockSpec((TB, T), lambda i: (i, 0)),   # batch-tiled logits
                pl.BlockSpec((T, D), lambda i: (0, 0)),    # resident topic vectors
            ],
            out_specs=pl.BlockSpec((TB, D), lambda i: (i, 0)),
        ),
        compiler_params=pltpu.CompilerParams(
            dimension_semantics=("parallel",),   # shard batch tiles across TCs (v7x)
            vmem_limit_bytes=vmem_limit,
        ),
        cost_estimate=cost,
    )(doc_weights, topic_vectors)


def make_orthonormal_topic_vectors(key, n_topics, embedding_dim):
    """Deterministic stand-in for scipy.stats.ortho_group.rvs: first n_topics
    rows of an orthogonal matrix obtained via QR of a Gaussian (init-time
    only; not part of the forward pass)."""
    assert n_topics < embedding_dim
    g = jax.random.normal(key, (embedding_dim, embedding_dim), dtype=jnp.float32)
    q, _ = jnp.linalg.qr(g)
    return q[:n_topics, :]  # [n_topics, embedding_dim], rows orthonormal


if __name__ == "__main__":
    key = jax.random.PRNGKey(0)
    k_tv, k_w1, k_w2 = jax.random.split(key, 3)

    n_topics = 8
    embedding_dim = 128  # n_topics < embedding_dim (module assert)
    topic_vectors = make_orthonormal_topic_vectors(k_tv, n_topics, embedding_dim)

    # Case 1: toy shape (single grid step), exact softmax, f32 output.
    doc_weights = jax.random.normal(k_w1, (8, n_topics), dtype=jnp.float32)
    out = jax.block_until_ready(topic_embedding_forward(doc_weights, topic_vectors))
    ref = jax.nn.softmax(doc_weights, axis=1) @ topic_vectors
    assert out.shape == (8, embedding_dim)
    assert out.dtype == jnp.float32
    assert jnp.allclose(out, ref, atol=1e-5, rtol=1e-5)

    # Case 2: exercise the batch-tiled, multi-step pipelined path
    # (grid-occupancy clamp + "parallel" batch axis).
    doc_weights2 = jax.random.normal(k_w2, (64, n_topics), dtype=jnp.float32)
    out2 = jax.block_until_ready(
        topic_embedding_forward(doc_weights2, topic_vectors, block_batch=16)
    )
    ref2 = jax.nn.softmax(doc_weights2, axis=1) @ topic_vectors
    assert out2.shape == (64, embedding_dim)
    assert jnp.allclose(out2, ref2, atol=1e-5, rtol=1e-5)

    # Case 3: recommended fast path — bf16 writeback (halves dominant HBM
    # stream) with approximate EUP reciprocal.
    out3 = jax.block_until_ready(
        topic_embedding_forward(doc_weights2, topic_vectors,
                                out_dtype=jnp.bfloat16,
                                approx_reciprocal=True)
    )
    assert out3.dtype == jnp.bfloat16
    assert jnp.allclose(out3.astype(jnp.float32), ref2, atol=2e-2, rtol=2e-2)

    print("KERNEL_OK")
</pallas_src>

<mosaic_0001>
module attributes {stable_mosaic.version = 11 : i64} {
  func.func @topic_embedding_kernel(%arg0: i32, %arg1: memref<8x8xf32, #tpu.memory_space<vmem>>, %arg2: memref<8x128xf32, #tpu.memory_space<vmem>>, %arg3: memref<8x128xf32, #tpu.memory_space<vmem>>) attributes {dimension_semantics = [#tpu.dimension_semantics<parallel>], iteration_bounds = array<i64: 1>, scalar_prefetch = 0 : i64, scratch_operands = 0 : i64, tpu.core_type = #tpu.core_type<tc>, window_params = [{transform_indices = @transform_0, window_bounds = array<i64: 8, 8>}, {pipeline_mode = #tpu.pipeline_mode<synchronous>, transform_indices = @transform_1, window_bounds = array<i64: 8, 128>}, {transform_indices = @transform_2, window_bounds = array<i64: 8, 128>}]} {
    %c0 = arith.constant 0 : index
    %c0_0 = arith.constant 0 : index
    %0 = vector.load %arg1[%c0, %c0_0] : memref<8x8xf32, #tpu.memory_space<vmem>>, vector<8x8xf32>
    %cst = arith.constant dense<0xFF800000> : vector<8xf32>
    %1 = vector.multi_reduction <maximumf>, %0, %cst [1] : vector<8x8xf32> to vector<8xf32>
    %2 = vector.shape_cast %1 : vector<8xf32> to vector<8x1xf32>
    %3 = vector.broadcast %2 : vector<8x1xf32> to vector<8x8xf32>
    %4 = arith.subf %0, %3 : vector<8x8xf32>
    %5 = math.exp %4 : vector<8x8xf32>
    %cst_1 = arith.constant dense<0.000000e+00> : vector<8xf32>
    %6 = vector.multi_reduction <add>, %5, %cst_1 [1] : vector<8x8xf32> to vector<8xf32>
    %7 = vector.shape_cast %6 : vector<8xf32> to vector<8x1xf32>
    %8 = vector.broadcast %7 : vector<8x1xf32> to vector<8x8xf32>
    %9 = arith.divf %5, %8 : vector<8x8xf32>
    %c0_2 = arith.constant 0 : index
    %c0_3 = arith.constant 0 : index
    %10 = vector.load %arg2[%c0_2, %c0_3] : memref<8x128xf32, #tpu.memory_space<vmem>>, vector<8x128xf32>
    %cst_4 = arith.constant dense<0.000000e+00> : vector<8x128xf32>
    %11 = tpu.matmul %9, %10, %cst_4 {dimension_numbers = #tpu.dot_dimension_numbers<[1], [0], [0], [1], [0, 0, 1, 1], [], []>} : vector<8x8xf32>, vector<8x128xf32>, vector<8x128xf32> -> vector<8x128xf32>
    %c0_5 = arith.constant 0 : index
    %c0_6 = arith.constant 0 : index
    %12 = vector.load %arg3[%c0_5, %c0_6] : memref<8x128xf32, #tpu.memory_space<vmem>>, vector<8x128xf32>
    tpu.vector_store %arg3[%c0_5, %c0_6], %11 {strides = array<i32>} : memref<8x128xf32, #tpu.memory_space<vmem>>, vector<8x128xf32>,
    return
  }
  func.func @transform_0(%arg0: i32) -> (i32, i32) {
    %c0_i32 = arith.constant 0 : i32
    %c0_i32_0 = arith.constant 0 : i32
    return %arg0, %c0_i32 : i32, i32
  }
  func.func @transform_1(%arg0: i32) -> (i32, i32) {
    %c0_i32 = arith.constant 0 : i32
    %c0_i32_0 = arith.constant 0 : i32
    %c0_i32_1 = arith.constant 0 : i32
    return %c0_i32, %c0_i32_0 : i32, i32
  }
  func.func @transform_2(%arg0: i32) -> (i32, i32) {
    %c0_i32 = arith.constant 0 : i32
    %c0_i32_0 = arith.constant 0 : i32
    return %arg0, %c0_i32 : i32, i32
  }
}

</mosaic_0001>

<bundles_post_ra>
// kernel: tpu_custom_call.1
= control target key start
LH: loop header
LB: loop body
LE: loop exit
PB: predicated region body
PF: predicated region fallthrough
CT: control target
= control target key end

     0   :  { %7 = vsyncpa [#allocation3], 0  ;;  %s288_s0 = inlined_call_operand.hbm [shape: f32[8,8], index: 0, kind: input, shape index: {}]   ;;  %s289_s1 = inlined_call_operand.hbm [shape: f32[8,128], index: 1, kind: input, shape index: {}]   ;;  %s290_s2 = inlined_call_operand.hbm [shape: f32[8,128], index: 2, kind: output, shape index: {}]  }
   0x1   :  { %8 = vsyncpa [#allocation6], 0 }
   0x2   :  { %9 = vsyncpa [#allocation4], 0  ;;  %s229_s9 = smov [#allocation2]   ;;  %s230_s11 = smov [#allocation5]  }
   0x3   :  { %s16_s10 = sshll.u32 %s229_s9, 4  ;;  %s26_s12 = sshll.u32 %s230_s11, 4  ;;  %s17_s10 = int_to_ptr.vmem [resolvable:$true] %s16_s10  ;;  %s27_s12 = int_to_ptr.vmem [resolvable:$true] %s26_s12 }
   0x4   :  { %s157_s15 = scalar_lea.hbm %s288_s0, 128 }
   0x5   :  { %p158_p0 = scmp.ne.s32.totalorder %s288_s0, %s157_s15  ;;  %p161_p1 = scmp.lt.u32.totalorder %s157_s15, %s288_s0 }
   0x7   :  { %p163_p2 = pnand %p161_p1, %p158_p0 }
   0x9   :  { %166 = shalt.err (!%p163_p2)
}
   0xa   :  { %s167_s20 = scalar_lea.vmem %s17_s10, 128  ;;  %p172_p4 = scmp.lt.s32.totalorder %s17_s10, %s17_s10 }
   0xb   :  { %p168_p3 = scmp.ne.s32.totalorder %s17_s10, %s167_s20  ;;  %p173_p5 = scmp.lt.s32.totalorder %s167_s20, %s167_s20 }
   0xd   :  { %p174_p6 = por %p173_p5, %p172_p4 }
   0xf   :  { %p175_p7 = pnand %p174_p6, %p168_p3 }
  0x11   :  { %178 = shalt.err (!%p175_p7)
}
  0x12   :  { %19 = dma.hbm_to_vmem [thread:$0]  %s288_s0, 128, %s17_s10, [#allocation3]  }
  0x13   :  { %s179_s25 = scalar_lea.hbm %s289_s1, 128 }
  0x14   :  { %p180_p8 = scmp.ne.s32.totalorder %s289_s1, %s179_s25  ;;  %p183_p9 = scmp.lt.u32.totalorder %s179_s25, %s289_s1 }
  0x16   :  { %p185_p10 = pnand %p183_p9, %p180_p8 }
  0x18   :  { %188 = shalt.err (!%p185_p10)
}
  0x19   :  { %s189_s30 = scalar_lea.vmem %s27_s12, 128  ;;  %p194_p12 = scmp.lt.s32.totalorder %s27_s12, %s27_s12 }
  0x1a   :  { %p190_p11 = scmp.ne.s32.totalorder %s27_s12, %s189_s30  ;;  %p195_p13 = scmp.lt.s32.totalorder %s189_s30, %s189_s30 }
  0x1c   :  { %p196_p0 = por %p195_p13, %p194_p12 }
  0x1e   :  { %p197_p1 = pnand %p196_p0, %p190_p11 }
  0x20   :  { %200 = shalt.err (!%p197_p1)
}
  0x21   :  { %29 = dma.hbm_to_vmem [thread:$0]  %s289_s1, 128, %s27_s12, [#allocation6]  }
  0x22   :  { %223 = dma.done.wait [#allocation3], 128  }
  0x23   :  { %224 = vsyncadd [#allocation3], 4294967168 }
  0x24   :  { %225 = dma.done.wait [#allocation6], 128  }
  0x25   :  { %226 = vsyncadd [#allocation6], 4294967168  ;;  %vm37_vm0 = vcmask 64512   ;;  %v36_v0 = vld [vmem:[#allocation2] sm:$0xff]  ;;  %v49_v7 = vld [vmem:[#allocation5] sm:$0xff]  ;;  %v231_v8 = vmov 0.0  }
  0x26   :  { %v38_v1 = vsel %vm37_vm0, %v36_v0, -inf  ;;  %143 = vmatprep.subr.mxu0 %v231_v8  ;;  %vm232_vm1 = vmmov 0   ;;  %s233_s1 = smov [#allocation7]  }
  0x27   :  { %39 = vmax.xlane.f32.xlu0 %v38_v1  ;;  %145 = vmatprep.mubr.msk.f32.mxu0 %vm232_vm1, %v231_v8  ;;  %s130_s4 = sshll.u32 %s233_s1, 4  ;;  %s131_s4 = int_to_ptr.vmem [resolvable:$true] %s130_s4 }
  0x28   :  { %144 = vmatpush3.msra.mxu0 %v49_v7  ;;  %s201_s5 = scalar_lea.vmem %s131_s4, 128  ;;  %p206_p3 = scmp.lt.s32.totalorder %s131_s4, %s131_s4 }
  0x29   :  { %p202_p2 = scmp.ne.s32.totalorder %s131_s4, %s201_s5  ;;  %p207_p4 = scmp.lt.s32.totalorder %s201_s5, %s201_s5 }
  0x2b   :  { %p208_p5 = por %p207_p4, %p206_p3 }
  0x2d   :  { %p209_p6 = pnand %p208_p5, %p202_p2 }
  0xb4   :  { %v40_v2 = vpop.xlane.xlu0 %39 }
  0xb5   :  { %v41_v3 = vsub.f32 %v36_v0, %v40_v2 }
  0xb7   :  { %v42_v4 = vmul.f32 1.442695, %v41_v3 }
  0xb9   :  { %153 = vpow2.f32 %v42_v4 }
  0xc3   :  { %v154_v5 = vpop.eup %153 }
  0xc4   :  { %v44_v6 = vsel %vm37_vm0, %v154_v5, 0.0 }
  0xc5   :  { %45 = vadd.xlane.f32.xlu0 %v44_v6 }
 0x152   :  { %v46_v9 = vpop.xlane.xlu0 %45 }
 0x153   :  { %155 = vrcp.f32 %v46_v9 }
 0x15d   :  { %v156_v10 = vpop.eup %155 }
 0x15e   :  { %v48_v11 = vmul.f32 %v156_v10, %v154_v5 }
 0x160   :  { %146 = vmatmul.mubr.msk.f32.vlgmr.msra.gmra.mrb[0].mxu0 %vm37_vm0, %v48_v11 }
 0x233   :  { %v119_v12 = vpop.f32.mrb[0].mxu0 }
 0x234   :  { %123 = vst [vmem:[#allocation7] sm:$0xff] %v119_v12  ;;  %v147_v13 = vpop.f32.mrb[1].mxu0 }
 0x235   :  { %212 = shalt.err (!%p209_p6)
}
 0x236   :  { %s213_s8 = scalar_lea.hbm %s290_s2, 128 }
 0x237   :  { %p214_p7 = scmp.ne.s32.totalorder %s290_s2, %s213_s8  ;;  %p217_p8 = scmp.lt.u32.totalorder %s213_s8, %s290_s2 }
 0x239   :  { %p219_p9 = pnand %p217_p8, %p214_p7 }
 0x23b   :  { %222 = shalt.err (!%p219_p9)
}
 0x23c   :  { %133 = dma.vmem_to_hbm [thread:$0]  %s131_s4, 128, %s290_s2, [#allocation4]  }
 0x23d   :  { %227 = dma.done.wait [#allocation4], 128  }
 0x23e   :  { %228 = vsyncadd [#allocation4], 4294967168 }
 0x23f   :  { %137 = vsyncpa [#allocation3], 1 }
 0x240   :  { %138 = vsyncpa [#allocation6], 1 }
 0x241   :  { %139 = vsyncpa [#allocation4], 1 }

</bundles_post_ra>
